<compile_context>
chip_gen: v7x
topology: tpu7x:2x2x1
jax: 0.10.0
libtpu: 0.0.40
codegen_flags: <defaults>
</compile_context>

<pallas_src>
import functools
import math

import jax
import jax.numpy as jnp
from jax import lax
from jax.experimental import pallas as pl
from jax.experimental.pallas import tpu as pltpu


def _rms_norm_kernel(x_ref, w_ref, o_ref, *, eps):
    """Normalize `tm` rows over the full feature axis (fp32 compute)."""
    # NOTE: in the ragged last grid block the out-of-range rows contain undefined
    # data and may produce NaN/Inf here; they are never written back to HBM, so
    # this is harmless by design (do not "fix" by padding on the host).
    x = x_ref[...].astype(jnp.float32)                   # (tm, D)
    ms = jnp.mean(x * x, axis=-1, keepdims=True)         # (tm, 1) cross-lane reduce (XLU)
    inv = lax.rsqrt(ms + eps)                            # rsqrt on the EUP
    w = w_ref[...].astype(jnp.float32)                   # (1, D) broadcast over rows
    o_ref[...] = (x * inv * w).astype(o_ref.dtype)


def _round_up(v, m):
    return (v + m - 1) // m * m


def _vmem_caps():
    """(tile-sizing budget, vmem_limit_bytes) — generation aware, conservative fallback."""
    try:
        cap = int(pltpu.get_tpu_info().vmem_capacity_bytes)
    except Exception:
        cap = 64 * 1024 * 1024                           # v7x per-TC size: safe everywhere
    budget = int(cap * 0.7)                              # ~90 MiB v5e/v6e, ~45 MiB v7x
    limit = int(min(cap - (8 << 20), budget + (16 << 20)))
    return budget, limit


def _pick_block_rows(m, d, itemsize):
    """Largest sublane-aligned row tile that fits the VMEM budget, >= 4 grid steps."""
    sub = 8 * max(1, 4 // itemsize)                      # 8 rows fp32, 16 rows bf16
    # Per row of VMEM: double-buffered in + out tiles (itemsize each) plus ~2 fp32
    # temporaries from the whole-tile fp32 compute (x.astype(f32), x*x).
    per_row = d * (4 * itemsize + 8)
    budget, _ = _vmem_caps()
    tm = max(sub, (budget // per_row) // sub * sub)
    # Never larger than the (sublane-rounded) row count.
    tm = min(tm, _round_up(max(m, 1), sub))
    # Keep >= 4 grid steps when M is large enough so the "parallel" axis feeds both
    # TensorCores (v7x megacore) and the software pipeline has blocks to overlap.
    min_steps = 4
    if m >= min_steps * sub:
        tm = min(tm, max(sub, _round_up(pl.cdiv(m, min_steps), sub)))
    return tm


@functools.partial(jax.jit, static_argnames=("eps",))
def _rms_norm(x, w, *, eps):
    orig_shape = x.shape
    d = orig_shape[-1]
    m = math.prod(orig_shape[:-1]) if len(orig_shape) > 1 else 1
    x2d = x.reshape(m, d)
    w2d = w.reshape(1, d)

    tm = _pick_block_rows(m, d, x2d.dtype.itemsize)
    _, vmem_limit = _vmem_caps()
    grid = (pl.cdiv(m, tm),)                             # ragged last block handled by Pallas

    flops = 4 * m * d                                    # square, reduce-add, two scales
    bytes_accessed = (x2d.size * x2d.dtype.itemsize
                      + w2d.size * w2d.dtype.itemsize
                      + m * d * x2d.dtype.itemsize)

    y2d = pl.pallas_call(
        functools.partial(_rms_norm_kernel, eps=eps),
        out_shape=jax.ShapeDtypeStruct((m, d), x2d.dtype),
        grid_spec=pltpu.PrefetchScalarGridSpec(
            num_scalar_prefetch=0,
            grid=grid,
            in_specs=[
                pl.BlockSpec((tm, d), lambda i: (i, 0)),   # x rows, lane-dense full D
                pl.BlockSpec((1, d), lambda i: (0, 0)),    # weight: resident, never re-DMA'd
            ],
            out_specs=pl.BlockSpec((tm, d), lambda i: (i, 0)),
        ),
        compiler_params=pltpu.CompilerParams(
            dimension_semantics=("parallel",),             # rows shard across TCs (v7x)
            vmem_limit_bytes=vmem_limit,
        ),
        cost_estimate=pl.CostEstimate(
            flops=flops, transcendentals=m, bytes_accessed=bytes_accessed),
    )(x2d, w2d)
    return y2d.reshape(orig_shape)


class RMSNorm:
    """JAX/Pallas port of the PyTorch RMSNorm (bf16 weight initialized to ones)."""

    def __init__(self, dim, eps=1e-6, dtype=jnp.bfloat16):
        self.dim = dim
        self.eps = float(eps)
        self.weight = jnp.ones((dim,), dtype=dtype)   # matches nn.Parameter(torch.ones)

    def __call__(self, x):
        assert x.shape[-1] == self.dim
        return _rms_norm(x, self.weight, eps=self.eps)


def _reference(x, w, eps):
    xf = x.astype(jnp.float32)
    inv = lax.rsqrt(jnp.mean(xf * xf, axis=-1, keepdims=True) + eps)
    return (xf * inv * w.astype(jnp.float32)).astype(x.dtype)


if __name__ == "__main__":
    key = jax.random.PRNGKey(0)
    kx, kw, kx2 = jax.random.split(key, 3)

    batch, seq, dim = 2, 8, 256
    x = (0.5 * jax.random.normal(kx, (batch, seq, dim), jnp.float32)).astype(jnp.bfloat16)

    layer = RMSNorm(dim, eps=1e-6)
    # Exercise the scale path with a non-trivial weight (same forward semantics).
    layer.weight = (1.0 + 0.1 * jax.random.normal(kw, (dim,), jnp.float32)).astype(jnp.bfloat16)

    y = jax.block_until_ready(layer(x))
    y_ref = _reference(x, layer.weight, layer.eps)
    assert y.shape == x.shape
    assert jnp.allclose(y.astype(jnp.float32), y_ref.astype(jnp.float32),
                        atol=2e-2, rtol=2e-2)

    # Second check: row count not a multiple of the sublane tile, exercising the
    # ragged (cdiv) last grid block with no host-side padding.
    x2 = (0.5 * jax.random.normal(kx2, (3, 5, dim), jnp.float32)).astype(jnp.bfloat16)
    y2 = jax.block_until_ready(layer(x2))
    y2_ref = _reference(x2, layer.weight, layer.eps)
    assert y2.shape == x2.shape
    assert jnp.allclose(y2.astype(jnp.float32), y2_ref.astype(jnp.float32),
                        atol=2e-2, rtol=2e-2)

    print("KERNEL_OK")
</pallas_src>

<mosaic_0001>
module attributes {stable_mosaic.version = 11 : i64} {
  func.func @_rms_norm_kernel(%arg0: i32, %arg1: memref<16x256xbf16, #tpu.memory_space<vmem>>, %arg2: memref<1x256xbf16, #tpu.memory_space<vmem>>, %arg3: memref<16x256xbf16, #tpu.memory_space<vmem>>) attributes {dimension_semantics = [#tpu.dimension_semantics<parallel>], iteration_bounds = array<i64: 1>, scalar_prefetch = 0 : i64, scratch_operands = 0 : i64, tpu.core_type = #tpu.core_type<tc>, window_params = [{transform_indices = @transform_0, window_bounds = array<i64: 16, 256>}, {pipeline_mode = #tpu.pipeline_mode<synchronous>, transform_indices = @transform_1, window_bounds = array<i64: 1, 256>}, {transform_indices = @transform_2, window_bounds = array<i64: 16, 256>}]} {
    %c0 = arith.constant 0 : index
    %c0_0 = arith.constant 0 : index
    %0 = vector.load %arg1[%c0, %c0_0] : memref<16x256xbf16, #tpu.memory_space<vmem>>, vector<16x256xbf16>
    %1 = arith.extf %0 : vector<16x256xbf16> to vector<16x256xf32>
    %2 = arith.mulf %1, %1 : vector<16x256xf32>
    %cst = arith.constant dense<0.000000e+00> : vector<16xf32>
    %3 = vector.multi_reduction <add>, %2, %cst [1] : vector<16x256xf32> to vector<16xf32>
    %4 = vector.shape_cast %3 : vector<16xf32> to vector<16x1xf32>
    %cst_1 = arith.constant 2.560000e+02 : f32
    %5 = vector.broadcast %cst_1 : f32 to vector<16x1xf32>
    %6 = arith.divf %4, %5 : vector<16x1xf32>
    %cst_2 = arith.constant 9.99999997E-7 : f32
    %7 = vector.broadcast %cst_2 : f32 to vector<16x1xf32>
    %8 = arith.addf %6, %7 : vector<16x1xf32>
    %9 = math.rsqrt %8 : vector<16x1xf32>
    %c0_3 = arith.constant 0 : index
    %c0_4 = arith.constant 0 : index
    %10 = vector.load %arg2[%c0_3, %c0_4] : memref<1x256xbf16, #tpu.memory_space<vmem>>, vector<1x256xbf16>
    %11 = arith.extf %10 : vector<1x256xbf16> to vector<1x256xf32>
    %12 = vector.broadcast %9 : vector<16x1xf32> to vector<16x256xf32>
    %13 = arith.mulf %1, %12 : vector<16x256xf32>
    %14 = vector.broadcast %11 : vector<1x256xf32> to vector<16x256xf32>
    %15 = arith.mulf %13, %14 : vector<16x256xf32>
    %16 = arith.truncf %15 : vector<16x256xf32> to vector<16x256xbf16>
    %c0_5 = arith.constant 0 : index
    %c0_6 = arith.constant 0 : index
    %17 = vector.load %arg3[%c0_5, %c0_6] : memref<16x256xbf16, #tpu.memory_space<vmem>>, vector<16x256xbf16>
    tpu.vector_store %arg3[%c0_5, %c0_6], %16 {strides = array<i32>} : memref<16x256xbf16, #tpu.memory_space<vmem>>, vector<16x256xbf16>,
    return
  }
  func.func @transform_0(%arg0: i32) -> (i32, i32) {
    %c0_i32 = arith.constant 0 : i32
    %c0_i32_0 = arith.constant 0 : i32
    return %arg0, %c0_i32 : i32, i32
  }
  func.func @transform_1(%arg0: i32) -> (i32, i32) {
    %c0_i32 = arith.constant 0 : i32
    %c0_i32_0 = arith.constant 0 : i32
    %c0_i32_1 = arith.constant 0 : i32
    return %c0_i32, %c0_i32_0 : i32, i32
  }
  func.func @transform_2(%arg0: i32) -> (i32, i32) {
    %c0_i32 = arith.constant 0 : i32
    %c0_i32_0 = arith.constant 0 : i32
    return %arg0, %c0_i32 : i32, i32
  }
}

</mosaic_0001>

<bundles_post_ra>
// kernel: _rms_norm.1
= control target key start
LH: loop header
LB: loop body
LE: loop exit
PB: predicated region body
PF: predicated region fallthrough
CT: control target
= control target key end

     0   :  { %7 = vsyncpa [#allocation3], 0  ;;  %s221_s0 = inlined_call_operand.hbm [shape: bf16[16,256], index: 0, kind: input, shape index: {}]   ;;  %s222_s1 = inlined_call_operand.vmem [shape: bf16[1,256], index: 1, kind: input, shape index: {}]   ;;  %s223_s2 = inlined_call_operand.hbm [shape: bf16[16,256], index: 2, kind: output, shape index: {}]  }
   0x1   :  { %8 = vsyncpa [#allocation4], 0  ;;  %s169_s9 = smov [#allocation2]   ;;  %s121_s13 = scalar_lea.hbm %s221_s0, 256 }
   0x2   :  { %s14_s10 = sshll.u32 %s169_s9, 4  ;;  %p122_p0 = scmp.ne.s32.totalorder %s221_s0, %s121_s13  ;;  %s15_s10 = int_to_ptr.vmem [resolvable:$true] %s14_s10 }
   0x3   :  { %p125_p1 = scmp.lt.u32.totalorder %s121_s13, %s221_s0 }
   0x5   :  { %p127_p2 = pnand %p125_p1, %p122_p0 }
   0x7   :  { %130 = shalt.err (!%p127_p2)
}
   0x8   :  { %s131_s18 = scalar_lea.vmem %s15_s10, 256  ;;  %p136_p4 = scmp.lt.s32.totalorder %s15_s10, %s15_s10 }
   0x9   :  { %p132_p3 = scmp.ne.s32.totalorder %s15_s10, %s131_s18  ;;  %p137_p5 = scmp.lt.s32.totalorder %s131_s18, %s131_s18 }
   0xb   :  { %p138_p6 = por %p137_p5, %p136_p4 }
   0xd   :  { %p139_p7 = pnand %p138_p6, %p132_p3 }
   0xf   :  { %142 = shalt.err (!%p139_p7)
}
  0x10   :  { %s170_s19 = smov 128   ;;  %s171_s20 = smov 8  }
  0x11   :  { %20 = dma.hbm_to_vmem [thread:$0]  %s221_s0, 256, %s15_s10, [#allocation3], %s170_s19, %s170_s19, %s171_s20  }
  0x12   :  { %165 = dma.done.wait [#allocation3], 256  }
  0x13   :  { %166 = vsyncadd [#allocation3], 4294967040  ;;  %v26_v0 = vld [vmem:[#allocation2] sm:$0xff]  ;;  %v27_v1 = vld [vmem:[#allocation2 + $0x8] sm:$0xff]  ;;  %v56_v12 = vlaneseq }
  0x14   :  { %v28_v2 = vunpack.c.l.bf16 %v26_v0  ;;  %v29_v3 = vunpack.c.h.bf16 %v26_v0  ;;  %v30_v4 = vunpack.c.l.bf16 %v27_v1  ;;  %v31_v5 = vunpack.c.h.bf16 %v27_v1  ;;  %v49_v17 = vld [vmem:[%s222_s1] sm:$0x3]  ;;  %s172_s1 = smov [#allocation5]  }
  0x15   :  { %v57_v15 = vshrl.u32 %v56_v12, 7  ;;  %v50_v20 = vunpack.c.l.bf16 %v49_v17  ;;  %s97_s24 = sshll.u32 %s172_s1, 4  ;;  %s98_s24 = int_to_ptr.vmem [resolvable:$true] %s97_s24 }
  0x16   :  { %v32_v6 = vmul.f32 %v28_v2, %v28_v2  ;;  %v33_v7 = vmul.f32 %v29_v3, %v29_v3  ;;  %v34_v8 = vmul.f32 %v30_v4, %v30_v4  ;;  %v35_v9 = vmul.f32 %v31_v5, %v31_v5  ;;  %s143_s25 = scalar_lea.vmem %s98_s24, 256  ;;  %p148_p9 = scmp.lt.s32.totalorder %s98_s24, %s98_s24 }
  0x17   :  { %v58_v21 = vsub.s32 0, %v57_v15  ;;  %v62_v22 = vsub.s32 2, %v57_v15  ;;  %p144_p8 = scmp.ne.s32.totalorder %s98_s24, %s143_s25  ;;  %p149_p10 = scmp.lt.s32.totalorder %s143_s25, %s143_s25 }
  0x18   :  { %v36_v10 = vadd.f32 %v33_v7, %v32_v6  ;;  %v39_v11 = vadd.f32 %v35_v9, %v34_v8 }
  0x19   :  { %v59_v24 = vrot.slane %v50_v20, %v58_v21  ;;  %v63_v25 = vrot.slane %v50_v20, %v62_v22  ;;  %p150_p11 = por %p149_p10, %p148_p9 }
  0x1a   :  { %37 = vadd.xlane.f32.xlu0 %v36_v10 }
  0x1b   :  { %v69_v26 = vrot.slane %v59_v24, %v58_v21  ;;  %v73_v27 = vrot.slane %v63_v25, %v58_v21  ;;  %p151_p12 = pnand %p150_p11, %p144_p8 }
  0x1e   :  { %40 = vadd.xlane.f32.xlu0 %v39_v11 }
  0xa7   :  { %v38_v13 = vpop.xlane.xlu0 %37 }
  0xa8   :  { %v43_v14 = vmul.f32 0.00390625, %v38_v13 }
  0xaa   :  { %v45_v16 = vadd.f32 1e-06, %v43_v14 }
  0xab   :  { %v41_v18 = vpop.xlane.xlu0 %40 }
  0xac   :  { %117 = vrsqrt.f32 %v45_v16  ;;  %v44_v19 = vmul.f32 0.00390625, %v41_v18 }
  0xae   :  { %v46_v23 = vadd.f32 1e-06, %v44_v19 }
  0xb0   :  { %119 = vrsqrt.f32 %v46_v23 }
  0xb6   :  { %v118_v28 = vpop.eup %117 }
  0xb7   :  { %v51_v29 = vmul.f32 %v118_v28, %v28_v2  ;;  %v52_v30 = vmul.f32 %v118_v28, %v29_v3 }
  0xb9   :  { %v74_v31 = vmul.f32 %v69_v26, %v51_v29  ;;  %v75_v32 = vmul.f32 %v73_v27, %v52_v30 }
  0xba   :  { %v120_v33 = vpop.eup %119 }
  0xbb   :  { %v53_v34 = vmul.f32 %v120_v33, %v30_v4  ;;  %v54_v35 = vmul.f32 %v120_v33, %v31_v5  ;;  %v111_v36 = vpack.c.bf16 %v75_v32, %v74_v31 }
  0xbd   :  { %v76_v37 = vmul.f32 %v69_v26, %v53_v34  ;;  %v77_v38 = vmul.f32 %v73_v27, %v54_v35  ;;  %90 = vst [vmem:[#allocation5] sm:$0xff] %v111_v36 }
  0xbf   :  { %v112_v39 = vpack.c.bf16 %v77_v38, %v76_v37 }
  0xc1   :  { %91 = vst [vmem:[#allocation5 + $0x8] sm:$0xff] %v112_v39 }
  0xc2   :  { %154 = shalt.err (!%p151_p12)
}
  0xc3   :  { %s155_s28 = scalar_lea.hbm %s223_s2, 256 }
  0xc4   :  { %p156_p13 = scmp.ne.s32.totalorder %s223_s2, %s155_s28  ;;  %p159_p0 = scmp.lt.u32.totalorder %s155_s28, %s223_s2 }
  0xc6   :  { %p161_p1 = pnand %p159_p0, %p156_p13 }
  0xc8   :  { %164 = shalt.err (!%p161_p1)
}
  0xc9   :  { %103 = dma.vmem_to_hbm [thread:$0]  %s98_s24, 256, %s223_s2, [#allocation4], %s170_s19, %s170_s19, %s171_s20  }
  0xca   :  { %167 = dma.done.wait [#allocation4], 256  }
  0xcb   :  { %168 = vsyncadd [#allocation4], 4294967040 }
  0xcc   :  { %107 = vsyncpa [#allocation3], 1 }
  0xcd   :  { %108 = vsyncpa [#allocation4], 1 }

</bundles_post_ra>
